<compile_context>
chip_gen: v5e
topology: v5e:2x2
jax: 0.10.0
libtpu: 0.0.40
codegen_flags: <defaults>
</compile_context>

<pallas_src>
import jax
import jax.numpy as jnp
from jax import lax
from jax.experimental import pallas as pl
from jax.experimental.pallas import tpu as pltpu


def _round_up(x, m):
    return (x + m - 1) // m * m


def _patch_embed_kernel(x_ref, w_ref, b_ref, o_ref):
    # x_ref: (tm, Kp) compute dtype (bf16), w_ref: (Kp, Np) compute dtype,
    # b_ref: (1, Np) f32, o_ref: (tm, Np) output dtype.
    acc = jnp.dot(x_ref[...], w_ref[...], preferred_element_type=jnp.float32)
    acc = acc + b_ref[...]          # bias in f32 epilogue (VPU, free under MXU)
    o_ref[...] = acc.astype(o_ref.dtype)


def patch_embed_pallas(x, conv_weight, conv_bias, patch_size, *,
                       tm=256, compute_dtype=jnp.bfloat16):
    """x: (B, C, H, W); conv_weight: (E, C, ph, pw); conv_bias: (E,).
    Returns (B, num_patches, E), matching PatchEmbed.forward."""
    B, C, H, W = x.shape
    E = conv_weight.shape[0]
    ph, pw = patch_size
    gh, gw = H // ph, W // pw
    P = gh * gw
    K = C * ph * pw
    M = B * P

    # --- wrapper-side layout plumbing (no compute) ---------------------------
    # (B, C, H, W) -> (B*P, C*ph*pw); flatten order (c, kh, kw) == Conv2d weight.
    patches = x.reshape(B, C, gh, ph, gw, pw)
    patches = patches.transpose(0, 2, 4, 1, 3, 5).reshape(M, K)
    # Conv2d weight (E, C, ph, pw) -> (K, E)
    w2d = conv_weight.reshape(E, K).T

    # Lane-dense padding: K, N to multiples of 128; rows to the row tile.
    Kp = _round_up(K, 128)
    Np = _round_up(E, 128)
    tm_eff = min(tm, _round_up(M, 8))   # shrink tile for small M (keeps grid useful)
    Mp = _round_up(M, tm_eff)

    patches = patches.astype(compute_dtype)
    if (Mp, Kp) != (M, K):
        xp = jnp.zeros((Mp, Kp), compute_dtype).at[:M, :K].set(patches)
    else:
        xp = patches

    w2d = w2d.astype(compute_dtype)
    if (Kp, Np) != (K, E):
        wp = jnp.zeros((Kp, Np), compute_dtype).at[:K, :E].set(w2d)
    else:
        wp = w2d

    bias_f32 = conv_bias.astype(jnp.float32)
    if Np != E:
        bp = jnp.zeros((1, Np), jnp.float32).at[0, :E].set(bias_f32)
    else:
        bp = bias_f32.reshape(1, Np)

    out_dtype = x.dtype
    grid = (Mp // tm_eff,)

    itm = jnp.dtype(compute_dtype).itemsize
    out_it = jnp.dtype(out_dtype).itemsize
    bytes_accessed = (Mp * Kp * itm + Kp * Np * itm + Np * 4 + Mp * Np * out_it)
    cost = pl.CostEstimate(flops=2 * Mp * Kp * Np,
                           transcendentals=0,
                           bytes_accessed=bytes_accessed)

    # VMEM budget: double-buffered x/out tiles + resident weight + bias + headroom.
    vmem_bytes = (2 * tm_eff * Kp * itm          # x tiles (double buffered)
                  + Kp * Np * itm                # weight, constant index -> resident
                  + 8 * Np * 4                   # bias block (sublane-padded)
                  + 2 * tm_eff * Np * out_it)    # out tiles (double buffered)
    vmem_limit = int(vmem_bytes + (8 << 20))

    out = pl.pallas_call(
        _patch_embed_kernel,
        out_shape=jax.ShapeDtypeStruct((Mp, Np), out_dtype),
        grid_spec=pltpu.PrefetchScalarGridSpec(
            num_scalar_prefetch=0,
            grid=grid,
            in_specs=[
                pl.BlockSpec((tm_eff, Kp), lambda i: (i, 0)),
                pl.BlockSpec((Kp, Np), lambda i: (0, 0)),   # resident weight
                pl.BlockSpec((1, Np), lambda i: (0, 0)),    # resident bias
            ],
            out_specs=pl.BlockSpec((tm_eff, Np), lambda i: (i, 0)),
        ),
        compiler_params=pltpu.CompilerParams(
            dimension_semantics=("parallel",),
            vmem_limit_bytes=vmem_limit),
        cost_estimate=cost,
    )(xp, wp, bp)

    # Strip padding, restore (B, num_patches, embed_dim). norm = Identity (no-op).
    return out[:M, :E].reshape(B, P, E)


def _reference_patch_embed(x, conv_weight, conv_bias, patch_size):
    """Pure-JAX reference matching PyTorch PatchEmbed.forward in f32."""
    ph, pw = patch_size
    y = lax.conv_general_dilated(
        x.astype(jnp.float32), conv_weight.astype(jnp.float32),
        window_strides=(ph, pw), padding="VALID",
        dimension_numbers=("NCHW", "OIHW", "NCHW"))
    y = y + conv_bias.astype(jnp.float32).reshape(1, -1, 1, 1)
    B, E, gh, gw = y.shape
    return y.reshape(B, E, gh * gw).transpose(0, 2, 1)


if __name__ == "__main__":
    # Small shapes consistent with the module (scaled-down img/patch/embed).
    batch = 2
    in_chans = 3
    img_size = 32
    patch = 8
    embed_dim = 128          # lane-dense (multiple of 128)

    key = jax.random.PRNGKey(0)
    kx, kw, kb = jax.random.split(key, 3)
    x = jax.random.normal(kx, (batch, in_chans, img_size, img_size), jnp.float32)
    conv_w = jax.random.normal(kw, (embed_dim, in_chans, patch, patch),
                               jnp.float32) * 0.05
    conv_b = jax.random.normal(kb, (embed_dim,), jnp.float32) * 0.05

    y = patch_embed_pallas(x, conv_w, conv_b, (patch, patch))
    y = jax.block_until_ready(y)

    num_patches = (img_size // patch) ** 2
    assert y.shape == (batch, num_patches, embed_dim)

    y_ref = _reference_patch_embed(x, conv_w, conv_b, (patch, patch))
    # Kernel runs the matmul in bf16 (f32 accumulation) -> bf16-level tolerance.
    assert jnp.allclose(y, y_ref, atol=2e-2, rtol=2e-2), "mismatch vs reference"

    print("KERNEL_OK")
</pallas_src>

<mosaic_0001>
module attributes {stable_mosaic.version = 11 : i64} {
  func.func @_patch_embed_kernel(%arg0: i32, %arg1: memref<32x256xbf16, #tpu.memory_space<vmem>>, %arg2: memref<256x128xbf16, #tpu.memory_space<vmem>>, %arg3: memref<1x128xf32, #tpu.memory_space<vmem>>, %arg4: memref<32x128xf32, #tpu.memory_space<vmem>>) attributes {dimension_semantics = [#tpu.dimension_semantics<parallel>], iteration_bounds = array<i64: 1>, scalar_prefetch = 0 : i64, scratch_operands = 0 : i64, tpu.core_type = #tpu.core_type<tc>, window_params = [{transform_indices = @transform_0, window_bounds = array<i64: 32, 256>}, {pipeline_mode = #tpu.pipeline_mode<synchronous>, transform_indices = @transform_1, window_bounds = array<i64: 256, 128>}, {pipeline_mode = #tpu.pipeline_mode<synchronous>, transform_indices = @transform_2, window_bounds = array<i64: 1, 128>}, {transform_indices = @transform_3, window_bounds = array<i64: 32, 128>}]} {
    %c0 = arith.constant 0 : index
    %c0_0 = arith.constant 0 : index
    %0 = vector.load %arg1[%c0, %c0_0] : memref<32x256xbf16, #tpu.memory_space<vmem>>, vector<32x256xbf16>
    %c0_1 = arith.constant 0 : index
    %c0_2 = arith.constant 0 : index
    %1 = vector.load %arg2[%c0_1, %c0_2] : memref<256x128xbf16, #tpu.memory_space<vmem>>, vector<256x128xbf16>
    %cst = arith.constant dense<0.000000e+00> : vector<32x128xf32>
    %2 = tpu.matmul %0, %1, %cst {dimension_numbers = #tpu.dot_dimension_numbers<[1], [0], [0], [1], [0, 0, 1, 1], [], []>} : vector<32x256xbf16>, vector<256x128xbf16>, vector<32x128xf32> -> vector<32x128xf32>
    %c0_3 = arith.constant 0 : index
    %c0_4 = arith.constant 0 : index
    %3 = vector.load %arg3[%c0_3, %c0_4] : memref<1x128xf32, #tpu.memory_space<vmem>>, vector<1x128xf32>
    %4 = vector.broadcast %3 : vector<1x128xf32> to vector<32x128xf32>
    %5 = arith.addf %2, %4 : vector<32x128xf32>
    %c0_5 = arith.constant 0 : index
    %c0_6 = arith.constant 0 : index
    %6 = vector.load %arg4[%c0_5, %c0_6] : memref<32x128xf32, #tpu.memory_space<vmem>>, vector<32x128xf32>
    tpu.vector_store %arg4[%c0_5, %c0_6], %5 {strides = array<i32>} : memref<32x128xf32, #tpu.memory_space<vmem>>, vector<32x128xf32>,
    return
  }
  func.func @transform_0(%arg0: i32) -> (i32, i32) {
    %c0_i32 = arith.constant 0 : i32
    %c0_i32_0 = arith.constant 0 : i32
    return %arg0, %c0_i32 : i32, i32
  }
  func.func @transform_1(%arg0: i32) -> (i32, i32) {
    %c0_i32 = arith.constant 0 : i32
    %c0_i32_0 = arith.constant 0 : i32
    %c0_i32_1 = arith.constant 0 : i32
    return %c0_i32, %c0_i32_0 : i32, i32
  }
  func.func @transform_2(%arg0: i32) -> (i32, i32) {
    %c0_i32 = arith.constant 0 : i32
    %c0_i32_0 = arith.constant 0 : i32
    %c0_i32_1 = arith.constant 0 : i32
    return %c0_i32, %c0_i32_0 : i32, i32
  }
  func.func @transform_3(%arg0: i32) -> (i32, i32) {
    %c0_i32 = arith.constant 0 : i32
    %c0_i32_0 = arith.constant 0 : i32
    return %arg0, %c0_i32 : i32, i32
  }
}

</mosaic_0001>

<bundles_post_ra>
// kernel: tpu_custom_call.1
= control target key start
LH: loop header
LB: loop body
LE: loop exit
PB: predicated region body
PF: predicated region fallthrough
CT: control target
= control target key end

     0   :  { %8 = vsyncpa [#allocation3], 0  ;;  %s512_s0 = inlined_call_operand.hbm [shape: bf16[32,256], index: 0, kind: input, shape index: {}]   ;;  %s513_s1 = inlined_call_operand.hbm [shape: bf16[256,128], index: 1, kind: input, shape index: {}]   ;;  %s514_s2 = inlined_call_operand.vmem [shape: f32[1,128], index: 2, kind: input, shape index: {}]   ;;  %s515_s3 = inlined_call_operand.hbm [shape: f32[32,128], index: 3, kind: output, shape index: {}]  }
   0x1   :  { %9 = vsyncpa [#allocation6], 0 }
   0x2   :  { %10 = vsyncpa [#allocation4], 0  ;;  %s15_s14 = sshll.u32 %s512_s0, 4  ;;  %s467_s15 = smov [#allocation2]   ;;  %s16_s14 = int_to_ptr.hbm [resolvable:$true] %s15_s14 }
   0x3   :  { %s17_s16 = sshll.u32 %s467_s15, 4  ;;  %s28_s19 = sshll.u32 %s513_s1, 4  ;;  %s18_s16 = int_to_ptr.vmem [resolvable:$true] %s17_s16  ;;  %s29_s19 = int_to_ptr.hbm [resolvable:$true] %s28_s19 }
   0x4   :  { %s468_s20 = smov 128   ;;  %s469_s21 = smov 8  }
   0x5   :  { %23 = dma.hbm_to_vmem [thread:$0]  %s16_s14, 512, %s18_s16, [#allocation3], %s468_s20, %s468_s20, %s469_s21  }
   0x6   :  { %s470_s22 = smov [#allocation5]   ;;  %s471_s24 = smov 64  }
   0x7   :  { %s30_s23 = sshll.u32 %s470_s22, 4  ;;  %s472_s0 = smov 4   ;;  %s31_s23 = int_to_ptr.vmem [resolvable:$true] %s30_s23 }
   0x8   :  { %36 = dma.hbm_to_vmem [thread:$0]  %s29_s19, 2048, %s31_s23, [#allocation6], %s471_s24, %s471_s24, %s472_s0  }
   0x9   :  { %461 = dma.done.wait [#allocation3], 512  }
   0xa   :  { %462 = vsyncadd [#allocation3], 4294966784 }
   0xb   :  { %463 = dma.done.wait [#allocation6], 2048  }
   0xc   :  { %464 = vsyncadd [#allocation6], 4294965248  ;;  %v356_v0 = vld [vmem:[#allocation5 + $0x38] sm:$0xff]  ;;  %v355_v2 = vld [vmem:[#allocation5 + $0x30] sm:$0xff]  ;;  %s473_s26 = smov [#allocation7]   ;;  %s251_s29 = sshll.u32 %s515_s3, 4  ;;  %s252_s29 = int_to_ptr.hbm [resolvable:$true] %s251_s29 }
   0xd   :  { %v364_v1 = vld [vmem:[#allocation5 + $0x78] sm:$0xff]  ;;  %203 = vmatpush.bf16.msra.mxu0 %v356_v0  ;;  %365 = vmatpush.bf16.msra.mxu2 %v356_v0  ;;  %v363_v3 = vld [vmem:[#allocation5 + $0x70] sm:$0xff]  ;;  %v354_v4 = vld [vmem:[#allocation5 + $0x28] sm:$0xff]  ;;  %s249_s27 = sshll.u32 %s473_s26, 4  ;;  %s250_s27 = int_to_ptr.vmem [resolvable:$true] %s249_s27 }
   0xe   :  { %222 = vmatpush.bf16.msra.mxu1 %v364_v1  ;;  %373 = vmatpush.bf16.msra.mxu3 %v364_v1  ;;  %v362_v5 = vld [vmem:[#allocation5 + $0x68] sm:$0xff]  ;;  %v353_v6 = vld [vmem:[#allocation5 + $0x20] sm:$0xff]  ;;  %v352_v8 = vld [vmem:[#allocation5 + $0x18] sm:$0xff] }
   0xf   :  { %v361_v7 = vld [vmem:[#allocation5 + $0x60] sm:$0xff]  ;;  %v360_v9 = vld [vmem:[#allocation5 + $0x58] sm:$0xff]  ;;  %v351_v10 = vld [vmem:[#allocation5 + $0x10] sm:$0xff] }
  0x10   :  { %v359_v11 = vld [vmem:[#allocation5 + $0x50] sm:$0xff]  ;;  %v350_v12 = vld [vmem:[#allocation5 + $0x8] sm:$0xff]  ;;  %v349_v14 = vld [vmem:[#allocation5] sm:$0xff] }
  0x11   :  { %204 = vmatpush.bf16.msra.mxu0 %v355_v2  ;;  %366 = vmatpush.bf16.msra.mxu2 %v355_v2  ;;  %v358_v13 = vld [vmem:[#allocation5 + $0x48] sm:$0xff]  ;;  %v357_v15 = vld [vmem:[#allocation5 + $0x40] sm:$0xff]  ;;  %v275_v18 = vld [vmem:[#allocation2 + $0x10] sm:$0xf] }
  0x12   :  { %223 = vmatpush.bf16.msra.mxu1 %v363_v3  ;;  %374 = vmatpush.bf16.msra.mxu3 %v363_v3  ;;  %v267_v16 = vld [vmem:[#allocation2] sm:$0xf]  ;;  %v346_v17 = vld [vmem:[#allocation2 + $0x4] sm:$0xf0]  ;;  %v348_v19 = vld [vmem:[#allocation2 + $0x14] sm:$0xf0] }
  0x13   :  { %v345_v20 = vld [vmem:[#allocation2 + $0x4] sm:$0xf]  ;;  %v269_v21 = vld [vmem:[#allocation2 + $0x8] sm:$0xf0]  ;;  %v347_v22 = vld [vmem:[#allocation2 + $0x14] sm:$0xf]  ;;  %v268_v24 = vor.u32 %v346_v17, %v267_v16  ;;  %v276_v25 = vor.u32 %v348_v19, %v275_v18 }
  0x14   :  { %v277_v23 = vld [vmem:[#allocation2 + $0x18] sm:$0xf0]  ;;  %v272_v26 = vor.u32 %v345_v20, %v269_v21  ;;  %v388_v28 = vld [vmem:[%s514_s2] ss:$0 sm:$0xff] }
  0x15   :  { %205 = vmatpush.bf16.msra.mxu0 %v354_v4  ;;  %367 = vmatpush.bf16.msra.mxu2 %v354_v4  ;;  %v280_v27 = vor.u32 %v347_v22, %v277_v23 }
  0x16   :  { %224 = vmatpush.bf16.msra.mxu1 %v362_v5  ;;  %375 = vmatpush.bf16.msra.mxu3 %v362_v5 }
  0x19   :  { %206 = vmatpush.bf16.msra.mxu0 %v353_v6  ;;  %368 = vmatpush.bf16.msra.mxu2 %v353_v6 }
  0x1a   :  { %225 = vmatpush.bf16.msra.mxu1 %v361_v7  ;;  %376 = vmatpush.bf16.msra.mxu3 %v361_v7 }
  0x1d   :  { %207 = vmatpush.bf16.msra.mxu0 %v352_v8  ;;  %369 = vmatpush.bf16.msra.mxu2 %v352_v8 }
  0x1e   :  { %226 = vmatpush.bf16.msra.mxu1 %v360_v9  ;;  %377 = vmatpush.bf16.msra.mxu3 %v360_v9 }
  0x21   :  { %208 = vmatpush.bf16.msra.mxu0 %v351_v10  ;;  %370 = vmatpush.bf16.msra.mxu2 %v351_v10 }
  0x22   :  { %227 = vmatpush.bf16.msra.mxu1 %v359_v11  ;;  %378 = vmatpush.bf16.msra.mxu3 %v359_v11 }
  0x25   :  { %209 = vmatpush.bf16.msra.mxu0 %v350_v12  ;;  %371 = vmatpush.bf16.msra.mxu2 %v350_v12 }
  0x26   :  { %228 = vmatpush.bf16.msra.mxu1 %v358_v13  ;;  %379 = vmatpush.bf16.msra.mxu3 %v358_v13 }
  0x29   :  { %210 = vmatpush.bf16.msra.mxu0 %v349_v14  ;;  %372 = vmatpush.bf16.msra.mxu2 %v349_v14 }
  0x2a   :  { %229 = vmatpush.bf16.msra.mxu1 %v357_v15  ;;  %380 = vmatpush.bf16.msra.mxu3 %v357_v15 }
  0x2c   :  { %211 = vmatmul.bf16.vlgmr.msra.gmra.mxu0 %v268_v24  ;;  %216 = vmatmul.bf16.vlgmr.msra.gmra.mxu2 %v276_v25 }
  0x2d   :  { %230 = vmatmul.bf16.vlgmr.msra.gmra.mxu1 %v272_v26  ;;  %235 = vmatmul.bf16.vlgmr.msra.gmra.mxu3 %v280_v27 }
  0xa9   :  { %v212_v29 = vpop.f32.mrf.mxu0 }
  0xaa   :  { %v213_v30 = vadd.f32 %v388_v28, %v212_v29  ;;  %v231_v31 = vpop.f32.mrf.mxu1 }
  0xac   :  { %v232_v32 = vadd.f32 %v231_v31, %v213_v30 }
  0xae   :  { %241 = vst [vmem:[#allocation7] sm:$0xff] %v232_v32 }
  0xaf   :  { %v217_v33 = vpop.f32.mrf.mxu2 }
  0xb0   :  { %v218_v34 = vadd.f32 %v388_v28, %v217_v33  ;;  %v236_v35 = vpop.f32.mrf.mxu3 }
  0xb1   :  { %v214_v36 = vpop.f32.mrf.mxu0 }
  0xb2   :  { %v237_v37 = vadd.f32 %v236_v35, %v218_v34  ;;  %v215_v38 = vadd.f32 %v388_v28, %v214_v36  ;;  %v233_v39 = vpop.f32.mrf.mxu1 }
  0xb4   :  { %243 = vst [vmem:[#allocation7 + $0x10] sm:$0xff] %v237_v37  ;;  %v234_v40 = vadd.f32 %v233_v39, %v215_v38 }
  0xb6   :  { %242 = vst [vmem:[#allocation7 + $0x8] sm:$0xff] %v234_v40 }
  0xb7   :  { %v219_v41 = vpop.f32.mrf.mxu2 }
  0xb8   :  { %v220_v42 = vadd.f32 %v388_v28, %v219_v41  ;;  %v238_v43 = vpop.f32.mrf.mxu3 }
  0xba   :  { %v239_v44 = vadd.f32 %v238_v43, %v220_v42 }
  0xbc   :  { %244 = vst [vmem:[#allocation7 + $0x18] sm:$0xff] %v239_v44 }
  0xbd   :  { %257 = dma.vmem_to_hbm [thread:$0]  %s250_s27, 512, %s252_s29, [#allocation4], %s468_s20, %s468_s20, %s469_s21  }
  0xbe   :  { %465 = dma.done.wait [#allocation4], 512  }
  0xbf   :  { %466 = vsyncadd [#allocation4], 4294966784 }
  0xc0   :  { %262 = vsyncpa [#allocation3], 1 }
  0xc1   :  { %263 = vsyncpa [#allocation6], 1 }
  0xc2   :  { %264 = vsyncpa [#allocation4], 1 }

</bundles_post_ra>
